<compile_context>
chip_gen: v5e
topology: v5e:2x2
jax: 0.10.0
libtpu: 0.0.40
codegen_flags: <defaults>
</compile_context>

<pallas_src>
from functools import partial

import jax
import jax.numpy as jnp
from jax.experimental import pallas as pl
from jax.experimental.pallas import tpu as pltpu

LEAKY_SLOPE = 0.01   # nn.LeakyReLU default
BN_EPS = 1e-5        # nn.BatchNorm2d default


# --------------------------------------------------------------------------- #
# Pass 1: conv-as-matmul + per-channel sum / sum-of-squares accumulation.
# Grid = (N, spatial_tiles); the stats blocks stay resident across the
# "arbitrary" tile axis and are zero-initialized with pl.when on the first tile.
# --------------------------------------------------------------------------- #
def conv_stats_kernel(p_ref, w_ref, conv_ref, sum_ref, sq_ref):
    """p_ref:    (KC, T)   bf16 im2col patches (KC = KH*KW*Cin, T = lane tile)
       w_ref:    (Cout, KC) bf16 flattened conv weights
       conv_ref: (Cout, T)  f32 raw conv output tile (lane-dense)
       sum_ref:  (Cout, 1)  f32 running per-channel sum   (resident accumulator)
       sq_ref:   (Cout, 1)  f32 running per-channel sumsq (resident accumulator)
    """
    t = pl.program_id(1)

    # One MXU contraction: all KH*KW taps folded into the contraction dim,
    # spatial on the 128-lane axis, f32 accumulation.
    acc = jnp.dot(w_ref[...], p_ref[...],
                  preferred_element_type=jnp.float32)          # (Cout, T) f32
    conv_ref[...] = acc

    @pl.when(t == 0)
    def _init():
        sum_ref[...] = jnp.zeros_like(sum_ref)
        sq_ref[...] = jnp.zeros_like(sq_ref)

    sum_ref[...] += jnp.sum(acc, axis=1, keepdims=True)
    sq_ref[...] += jnp.sum(acc * acc, axis=1, keepdims=True)


# --------------------------------------------------------------------------- #
# Pass 2: BatchNorm (batch statistics, biased variance) + LeakyReLU, all in f32.
# --------------------------------------------------------------------------- #
def bn_act_kernel(conv_ref, sum_ref, sq_ref, g_ref, b_ref, o_ref, *, inv_count):
    mean = sum_ref[...] * inv_count                      # (Cout, 1)
    var = sq_ref[...] * inv_count - mean * mean          # E[x^2] - E[x]^2
    inv_std = jax.lax.rsqrt(var + BN_EPS)
    scale = g_ref[...] * inv_std
    shift = b_ref[...] - mean * scale
    y = conv_ref[...] * scale + shift                    # (Cout, T), lane broadcast
    o_ref[...] = jnp.where(y > 0.0, y, LEAKY_SLOPE * y).astype(o_ref.dtype)


# --------------------------------------------------------------------------- #
# Wrapper: NCHW in -> NCHW out (same convention as the PyTorch module).
# --------------------------------------------------------------------------- #
def seb_forward(x_nchw, w_oihw, conv_bias, gamma, beta, *, stride, padding,
                lane_tile=128, compute_dtype=jnp.bfloat16):
    # Training-mode BatchNorm subtracts the per-channel batch mean, which exactly
    # cancels any per-channel constant -> the conv bias is redundant; skip it.
    del conv_bias

    N, Cin, H, W = x_nchw.shape
    Cout, _, KH, KW = w_oihw.shape
    out_h = (H + 2 * padding - KH) // stride + 1
    out_w = (W + 2 * padding - KW) // stride + 1
    HW = out_h * out_w
    KC = KH * KW * Cin

    # ---- im2col patches (NCHW-native, no NHWC round trip): (N, KC, HW) --------
    xp = jnp.pad(x_nchw.astype(jnp.float32),
                 ((0, 0), (0, 0), (padding, padding), (padding, padding)))
    taps = []
    for kh in range(KH):
        for kw in range(KW):
            taps.append(jax.lax.slice(
                xp,
                (0, 0, kh, kw),
                (N, Cin,
                 kh + (out_h - 1) * stride + 1,
                 kw + (out_w - 1) * stride + 1),
                (1, 1, stride, stride)))                 # (N, Cin, out_h, out_w)
    patches = jnp.stack(taps, axis=1).reshape(N, KC, HW)

    # Pad the spatial (lane) axis up to a multiple of the tile. Zero columns
    # produce a conv output of exactly 0 (no bias), so they add nothing to the
    # BN sums; the statistics use the true element count below.
    T = lane_tile  # 128 keeps multi-tile accumulation exercised; raise for big HW
    HW_pad = ((HW + T - 1) // T) * T
    if HW_pad != HW:
        patches = jnp.pad(patches, ((0, 0), (0, 0), (0, HW_pad - HW)))
    n_tiles = HW_pad // T

    patches = patches.astype(compute_dtype)              # bf16 MXU operands
    w_mat = jnp.transpose(w_oihw, (0, 2, 3, 1)).reshape(Cout, KC)
    w_mat = w_mat.astype(compute_dtype)

    grid = (N, n_tiles)

    # ---- pass 1: conv + per-channel stats -------------------------------------
    conv_raw, psum, psq = pl.pallas_call(
        conv_stats_kernel,
        grid=grid,
        in_specs=[
            pl.BlockSpec((None, KC, T), lambda n, t: (n, 0, t)),    # patches
            pl.BlockSpec((Cout, KC), lambda n, t: (0, 0)),          # weights
        ],
        out_specs=(
            pl.BlockSpec((None, Cout, T), lambda n, t: (n, 0, t)),  # raw conv
            pl.BlockSpec((None, Cout, 1), lambda n, t: (n, 0, 0)),  # sum acc
            pl.BlockSpec((None, Cout, 1), lambda n, t: (n, 0, 0)),  # sumsq acc
        ),
        out_shape=(
            jax.ShapeDtypeStruct((N, Cout, HW_pad), jnp.float32),
            jax.ShapeDtypeStruct((N, Cout, 1), jnp.float32),
            jax.ShapeDtypeStruct((N, Cout, 1), jnp.float32),
        ),
        compiler_params=pltpu.CompilerParams(
            dimension_semantics=("parallel", "arbitrary"),
            vmem_limit_bytes=32 * 1024 * 1024),
    )(patches, w_mat)

    # Tiny (N x Cout) cross-batch reduction of the per-sample partial sums.
    tot_sum = jnp.sum(psum, axis=0)                      # (Cout, 1)
    tot_sq = jnp.sum(psq, axis=0)                        # (Cout, 1)

    g2 = gamma.reshape(Cout, 1).astype(jnp.float32)
    b2 = beta.reshape(Cout, 1).astype(jnp.float32)

    # ---- pass 2: normalize + affine + LeakyReLU --------------------------------
    out_flat = pl.pallas_call(
        partial(bn_act_kernel, inv_count=1.0 / float(N * HW)),
        grid=grid,
        in_specs=[
            pl.BlockSpec((None, Cout, T), lambda n, t: (n, 0, t)),  # raw conv
            pl.BlockSpec((Cout, 1), lambda n, t: (0, 0)),           # total sum
            pl.BlockSpec((Cout, 1), lambda n, t: (0, 0)),           # total sumsq
            pl.BlockSpec((Cout, 1), lambda n, t: (0, 0)),           # gamma
            pl.BlockSpec((Cout, 1), lambda n, t: (0, 0)),           # beta
        ],
        out_specs=pl.BlockSpec((None, Cout, T), lambda n, t: (n, 0, t)),
        out_shape=jax.ShapeDtypeStruct((N, Cout, HW_pad), jnp.float32),
        compiler_params=pltpu.CompilerParams(
            dimension_semantics=("parallel", "parallel"),
            vmem_limit_bytes=32 * 1024 * 1024),
    )(conv_raw, tot_sum, tot_sq, g2, b2)

    # Output is already NCHW-flat and lane-dense: drop pad columns and reshape.
    return out_flat[:, :, :HW].reshape(N, Cout, out_h, out_w)


# --------------------------------------------------------------------------- #
# Pure-XLA reference (PyTorch SEB semantics: conv+bias, train-mode BN, LeakyReLU).
# --------------------------------------------------------------------------- #
def seb_reference(x_nchw, w_oihw, conv_bias, gamma, beta, *, stride, padding,
                  conv_dtype=jnp.float32):
    y = jax.lax.conv_general_dilated(
        x_nchw.astype(conv_dtype), w_oihw.astype(conv_dtype),
        (stride, stride), [(padding, padding), (padding, padding)],
        dimension_numbers=("NCHW", "OIHW", "NCHW"),
        preferred_element_type=jnp.float32)
    y = y + conv_bias.reshape(1, -1, 1, 1).astype(jnp.float32)
    mean = jnp.mean(y, axis=(0, 2, 3), keepdims=True)
    var = jnp.mean((y - mean) ** 2, axis=(0, 2, 3), keepdims=True)
    y = (y - mean) * jax.lax.rsqrt(var + BN_EPS)
    y = y * gamma.reshape(1, -1, 1, 1) + beta.reshape(1, -1, 1, 1)
    return jnp.where(y > 0, y, LEAKY_SLOPE * y)


if __name__ == "__main__":
    # SEB(in_channels=4, out_channels=8, kernel_size=3, stride=1, padding=1, bias=True)
    N, Cin, H, W = 2, 4, 16, 16
    Cout, K, stride, padding = 8, 3, 1, 1

    key = jax.random.PRNGKey(0)
    kx, kw, kb, kg, kbe = jax.random.split(key, 5)

    x = jax.random.normal(kx, (N, Cin, H, W), jnp.float32)
    w = 0.1 * jax.random.normal(kw, (Cout, Cin, K, K), jnp.float32)   # OIHW
    conv_bias = 0.1 * jax.random.normal(kb, (Cout,), jnp.float32)
    gamma = 1.0 + 0.1 * jax.random.normal(kg, (Cout,), jnp.float32)   # BN weight
    beta = 0.1 * jax.random.normal(kbe, (Cout,), jnp.float32)         # BN bias

    out = seb_forward(x, w, conv_bias, gamma, beta,
                      stride=stride, padding=padding)
    out = jax.block_until_ready(out)
    assert out.shape == (N, Cout, H, W)

    # Reference with the conv operands cast to the same MXU compute dtype (bf16),
    # so the comparison isolates kernel structure (and verifies both the
    # single-pass variance and the analytic bias cancellation).
    ref = seb_reference(x, w, conv_bias, gamma, beta,
                        stride=stride, padding=padding,
                        conv_dtype=jnp.bfloat16)
    max_err = float(jnp.max(jnp.abs(out - ref)))
    assert jnp.allclose(out, ref, atol=2e-3, rtol=2e-3), \
        f"mismatch vs reference (max abs err {max_err})"

    print("KERNEL_OK")
</pallas_src>

<mosaic_0001>
module attributes {stable_mosaic.version = 11 : i64} {
  func.func @conv_stats_kernel(%arg0: i32, %arg1: i32, %arg2: memref<1x36x128xbf16, #tpu.memory_space<vmem>>, %arg3: memref<8x36xbf16, #tpu.memory_space<vmem>>, %arg4: memref<1x8x128xf32, #tpu.memory_space<vmem>>, %arg5: memref<1x8x1xf32, #tpu.memory_space<vmem>>, %arg6: memref<1x8x1xf32, #tpu.memory_space<vmem>>) attributes {dimension_semantics = [#tpu.dimension_semantics<parallel>, #tpu.dimension_semantics<arbitrary>], iteration_bounds = array<i64: 2, 2>, scalar_prefetch = 0 : i64, scratch_operands = 0 : i64, tpu.core_type = #tpu.core_type<tc>, window_params = [{transform_indices = @transform_0, window_bounds = array<i64: 1, 36, 128>}, {pipeline_mode = #tpu.pipeline_mode<synchronous>, transform_indices = @transform_1, window_bounds = array<i64: 8, 36>}, {transform_indices = @transform_2, window_bounds = array<i64: 1, 8, 128>}, {transform_indices = @transform_3, window_bounds = array<i64: 1, 8, 1>}, {transform_indices = @transform_4, window_bounds = array<i64: 1, 8, 1>}]} {
    %c0 = arith.constant 0 : index
    %c0_0 = arith.constant 0 : index
    %0 = vector.load %arg3[%c0, %c0_0] : memref<8x36xbf16, #tpu.memory_space<vmem>>, vector<8x36xbf16>
    %c0_1 = arith.constant 0 : index
    %c0_2 = arith.constant 0 : index
    %c0_3 = arith.constant 0 : index
    %1 = vector.load %arg2[%c0_1, %c0_2, %c0_3] : memref<1x36x128xbf16, #tpu.memory_space<vmem>>, vector<1x36x128xbf16>
    %2 = vector.shape_cast %1 : vector<1x36x128xbf16> to vector<36x128xbf16>
    %cst = arith.constant dense<0.000000e+00> : vector<8x128xf32>
    %3 = tpu.matmul %0, %2, %cst {dimension_numbers = #tpu.dot_dimension_numbers<[1], [0], [0], [1], [0, 0, 1, 1], [], []>} : vector<8x36xbf16>, vector<36x128xbf16>, vector<8x128xf32> -> vector<8x128xf32>
    %c0_4 = arith.constant 0 : index
    %c0_5 = arith.constant 0 : index
    %c0_6 = arith.constant 0 : index
    %4 = vector.load %arg4[%c0_4, %c0_5, %c0_6] : memref<1x8x128xf32, #tpu.memory_space<vmem>>, vector<1x8x128xf32>
    %5 = vector.shape_cast %4 : vector<1x8x128xf32> to vector<8x128xf32>
    %6 = vector.shape_cast %3 : vector<8x128xf32> to vector<1x8x128xf32>
    tpu.vector_store %arg4[%c0_4, %c0_5, %c0_6], %6 {strides = array<i32>} : memref<1x8x128xf32, #tpu.memory_space<vmem>>, vector<1x8x128xf32>,
    %c0_i32 = arith.constant 0 : i32
    %7 = arith.cmpi eq, %arg1, %c0_i32 : i32
    %8 = arith.extui %7 : i1 to i32
    %c0_i32_7 = arith.constant 0 : i32
    %9 = arith.cmpi ne, %8, %c0_i32_7 : i32
    scf.if %9 {
      %cst_22 = arith.constant 0.000000e+00 : f32
      %27 = vector.broadcast %cst_22 : f32 to vector<8x1xf32>
      %c0_23 = arith.constant 0 : index
      %c0_24 = arith.constant 0 : index
      %c0_25 = arith.constant 0 : index
      %28 = vector.load %arg5[%c0_23, %c0_24, %c0_25] : memref<1x8x1xf32, #tpu.memory_space<vmem>>, vector<1x8x1xf32>
      %29 = vector.shape_cast %28 : vector<1x8x1xf32> to vector<8x1xf32>
      %30 = vector.shape_cast %27 : vector<8x1xf32> to vector<1x8x1xf32>
      tpu.vector_store %arg5[%c0_23, %c0_24, %c0_25], %30 {strides = array<i32>} : memref<1x8x1xf32, #tpu.memory_space<vmem>>, vector<1x8x1xf32>,
      %cst_26 = arith.constant 0.000000e+00 : f32
      %31 = vector.broadcast %cst_26 : f32 to vector<8x1xf32>
      %c0_27 = arith.constant 0 : index
      %c0_28 = arith.constant 0 : index
      %c0_29 = arith.constant 0 : index
      %32 = vector.load %arg6[%c0_27, %c0_28, %c0_29] : memref<1x8x1xf32, #tpu.memory_space<vmem>>, vector<1x8x1xf32>
      %33 = vector.shape_cast %32 : vector<1x8x1xf32> to vector<8x1xf32>
      %34 = vector.shape_cast %31 : vector<8x1xf32> to vector<1x8x1xf32>
      tpu.vector_store %arg6[%c0_27, %c0_28, %c0_29], %34 {strides = array<i32>} : memref<1x8x1xf32, #tpu.memory_space<vmem>>, vector<1x8x1xf32>,
    } else {
    }
    %c0_8 = arith.constant 0 : index
    %c0_9 = arith.constant 0 : index
    %c0_10 = arith.constant 0 : index
    %10 = vector.load %arg5[%c0_8, %c0_9, %c0_10] : memref<1x8x1xf32, #tpu.memory_space<vmem>>, vector<1x8x1xf32>
    %11 = vector.shape_cast %10 : vector<1x8x1xf32> to vector<8x1xf32>
    %cst_11 = arith.constant dense<0.000000e+00> : vector<8xf32>
    %12 = vector.multi_reduction <add>, %3, %cst_11 [1] : vector<8x128xf32> to vector<8xf32>
    %13 = vector.shape_cast %12 : vector<8xf32> to vector<8x1xf32>
    %14 = arith.addf %11, %13 : vector<8x1xf32>
    %c0_12 = arith.constant 0 : index
    %c0_13 = arith.constant 0 : index
    %c0_14 = arith.constant 0 : index
    %15 = vector.load %arg5[%c0_12, %c0_13, %c0_14] : memref<1x8x1xf32, #tpu.memory_space<vmem>>, vector<1x8x1xf32>
    %16 = vector.shape_cast %15 : vector<1x8x1xf32> to vector<8x1xf32>
    %17 = vector.shape_cast %14 : vector<8x1xf32> to vector<1x8x1xf32>
    tpu.vector_store %arg5[%c0_12, %c0_13, %c0_14], %17 {strides = array<i32>} : memref<1x8x1xf32, #tpu.memory_space<vmem>>, vector<1x8x1xf32>,
    %c0_15 = arith.constant 0 : index
    %c0_16 = arith.constant 0 : index
    %c0_17 = arith.constant 0 : index
    %18 = vector.load %arg6[%c0_15, %c0_16, %c0_17] : memref<1x8x1xf32, #tpu.memory_space<vmem>>, vector<1x8x1xf32>
    %19 = vector.shape_cast %18 : vector<1x8x1xf32> to vector<8x1xf32>
    %20 = arith.mulf %3, %3 : vector<8x128xf32>
    %cst_18 = arith.constant dense<0.000000e+00> : vector<8xf32>
    %21 = vector.multi_reduction <add>, %20, %cst_18 [1] : vector<8x128xf32> to vector<8xf32>
    %22 = vector.shape_cast %21 : vector<8xf32> to vector<8x1xf32>
    %23 = arith.addf %19, %22 : vector<8x1xf32>
    %c0_19 = arith.constant 0 : index
    %c0_20 = arith.constant 0 : index
    %c0_21 = arith.constant 0 : index
    %24 = vector.load %arg6[%c0_19, %c0_20, %c0_21] : memref<1x8x1xf32, #tpu.memory_space<vmem>>, vector<1x8x1xf32>
    %25 = vector.shape_cast %24 : vector<1x8x1xf32> to vector<8x1xf32>
    %26 = vector.shape_cast %23 : vector<8x1xf32> to vector<1x8x1xf32>
    tpu.vector_store %arg6[%c0_19, %c0_20, %c0_21], %26 {strides = array<i32>} : memref<1x8x1xf32, #tpu.memory_space<vmem>>, vector<1x8x1xf32>,
    return
  }
  func.func @transform_0(%arg0: i32, %arg1: i32) -> (i32, i32, i32) {
    %c0_i32 = arith.constant 0 : i32
    %c0_i32_0 = arith.constant 0 : i32
    return %arg0, %c0_i32, %arg1 : i32, i32, i32
  }
  func.func @transform_1(%arg0: i32, %arg1: i32) -> (i32, i32) {
    %c0_i32 = arith.constant 0 : i32
    %c0_i32_0 = arith.constant 0 : i32
    %c0_i32_1 = arith.constant 0 : i32
    return %c0_i32, %c0_i32_0 : i32, i32
  }
  func.func @transform_2(%arg0: i32, %arg1: i32) -> (i32, i32, i32) {
    %c0_i32 = arith.constant 0 : i32
    %c0_i32_0 = arith.constant 0 : i32
    return %arg0, %c0_i32, %arg1 : i32, i32, i32
  }
  func.func @transform_3(%arg0: i32, %arg1: i32) -> (i32, i32, i32) {
    %c0_i32 = arith.constant 0 : i32
    %c0_i32_0 = arith.constant 0 : i32
    %c0_i32_1 = arith.constant 0 : i32
    return %arg0, %c0_i32, %c0_i32_0 : i32, i32, i32
  }
  func.func @transform_4(%arg0: i32, %arg1: i32) -> (i32, i32, i32) {
    %c0_i32 = arith.constant 0 : i32
    %c0_i32_0 = arith.constant 0 : i32
    %c0_i32_1 = arith.constant 0 : i32
    return %arg0, %c0_i32, %c0_i32_0 : i32, i32, i32
  }
}

</mosaic_0001>

<bundles_post_ra>
// kernel: tpu_custom_call.1
= control target key start
LH: loop header
LB: loop body
LE: loop exit
PB: predicated region body
PF: predicated region fallthrough
CT: control target
= control target key end

     0   :  { %s896_s0 = inlined_call_operand.vmem [shape: bf16[2,36,256], index: 0, kind: input, shape index: {}]   ;;  %s897_s1 = inlined_call_operand.vmem [shape: bf16[8,36], index: 1, kind: input, shape index: {}]   ;;  %s898_s2 = inlined_call_operand.hbm [shape: f32[2,8,256], index: 2, kind: output, shape index: {0}]   ;;  %s899_s3 = inlined_call_operand.vmem [shape: f32[2,8,1], index: 3, kind: output, shape index: {1}]   ;;  %s900_s4 = inlined_call_operand.vmem [shape: f32[2,8,1], index: 4, kind: output, shape index: {2}]  }
   0x1   :  { %901 = sst [smem:[#allocation6_spill]] %s896_s0 }
   0x2   :  { %902 = sst [smem:[#allocation7_spill]] %s897_s1 }
   0x3   :  { %10 = vsyncpa [#allocation4], 0 }
   0x4   :  { %12 = vsyncpa [#allocation4 + $0x1], 0  ;;  %s740_s15 = smov 0   ;;  %s742_s16 = smov 0  }
   0x5   :  { %s744_s17 = smov 0   ;;  %s746_s18 = smov 0  }
   0x6   :  { %s748_s19 = smov 0   ;;  %s750_s20 = smov 0  }
   0x7   :  { %s752_s21 = smov 0   ;;  %s754_s22 = smov 0  }
   0x8 LB: > { %s517_s23 = sadd.s32 4294967295, %s712_s22   ;;  %s518_s24 = sadd.s32 4294967294, %s712_s22   ;;  %s712_s22 = sphi %s754_s22, %s18_s22   ;;  %s708_s21 = sphi %s752_s21, %s914_s21   ;;  %s704_s20 = sphi %s750_s20, %s913_s20   ;;  %s700_s19 = sphi %s748_s19, %s912_s19   ;;  %s696_s18 = sphi %s746_s18, %s911_s18   ;;  %s692_s17 = sphi %s744_s17, %s910_s17   ;;  %s688_s16 = sphi %s742_s16, %s909_s16   ;;  %s684_s15 = sphi %s740_s15, %s908_s15  }
   0x9   : > { %s27_s25 = sadd.s32 1, %s704_s20  ;;  %s30_s26 = sadd.s32 1, %s708_s21 }
   0xa   : > { %p28_p0 = scmp.ge.s32.totalorder %s27_s25, 2  ;;  %p46_p1 = scmp.ne.s32.totalorder %s692_s17, %s688_s16 }
   0xb   : > { %p47_p2 = scmp.eq.s32.totalorder %s712_s22, 0  ;;  %p99_p5 = scmp.eq.s32.totalorder %s517_s23, 3 }
   0xc   : > { %s916_s25 = smov (%p28_p0, %s27_s25), 0  ;;  %s918_s26 = smov (!%p28_p0, %s30_s26), %s708_s21 }
   0xd   : > { %s35_s27 = ssub.s32 %s704_s20, %s916_s25  ;;  %p792_p3 = por %p47_p2, %p46_p1 }
   0xe   : > { %p32_p4 = scmp.ge.s32.totalorder %s918_s26, 2  ;;  %p104_p6 = scmp.ne.s32.totalorder %s688_s16, %s684_s15 }
   0xf   : > { %p105_p7 = scmp.eq.s32.totalorder %s518_s24, 3  ;;  %p800_p8 = por %p99_p5, %p46_p1 }
  0x10   : > { %s920_s26 = smov (%p32_p4, %s918_s26), 0  ;;  %s39_s7 = sadd.s32 1, %s692_s17 }
  0x11   : > { %p804_p9 = por %p105_p7, %p104_p6  ;;  %s34_s5 = ssub.s32 %s708_s21, %s920_s26 }
  0x12   : > { %s36_s6 = sor.u32 %s35_s27, %s34_s5  ;;  %p520_p11 = scmp.ge.s32.totalorder %s712_s22, 4 }
  0x13   : > { %p37_p10 = scmp.eq.s32.totalorder %s36_s6, 0 }
  0x14   : > { %176 = sbr.rel (%p520_p11) target bundleno = 39 (0x27), region = 20 }
  0x15   : > { %s812_s8 = scalar_select %p37_p10, %s692_s17, %s39_s7  }
  0x19   : > { %179 = sbr.rel (!%p792_p3) target bundleno = 39 (0x27), region = 24  ;;  %s181_s9 = sand.u32 (%p792_p3), 1, %s692_s17  }
  0x1a   : > { %s544_s10 = smul.u32 (%p792_p3), 10, %s708_s21  ;;  %s906_s0 = sld [smem:[#allocation6_spill]] (%p792_p3) }
  0x1b   : > { %s543_s11 = smul.u32 (%p792_p3), 20, %s181_s9 }
  0x1c   : > { %s185_s12 = sadd.s32 (%p792_p3), %s704_s20, %s544_s10 }
  0x1d   : > { %s521_s13 = sshll.u32 (%p792_p3), %s185_s12, 2  ;;  %s183_s27 = scalar_lea.vmem (%p792_p3), [#allocation2], %s543_s11 }
  0x20   : > { %s187_s24 = scalar_lea.vmem %s906_s0, %s521_s13 }
  0x21   : > { %v204_v0 = vld [vmem:[%s187_s24] sm:$0xf]  ;;  %v206_v1 = vld [vmem:[%s187_s24 + $0x8] sm:$0xf]  ;;  %v208_v2 = vld [vmem:[%s187_s24 + $0x10] sm:$0xf] }
  0x22   : > { %205 = vst [vmem:[%s183_s27] sm:$0xf] %v204_v0  ;;  %v210_v3 = vld [vmem:[%s187_s24 + $0x18] sm:$0xf]  ;;  %v212_v4 = vld [vmem:[%s187_s24 + $0x20] sm:$0xf] }
  0x23   : > { %207 = vst [vmem:[%s183_s27 + $0x4] sm:$0xf] %v206_v1 }
  0x24   : > { %209 = vst [vmem:[%s183_s27 + $0x8] sm:$0xf] %v208_v2 }
  0x25   : > { %211 = vst [vmem:[%s183_s27 + $0xc] sm:$0xf] %v210_v3 }
  0x26   : > { %213 = vst [vmem:[%s183_s27 + $0x10] sm:$0xf] %v212_v4 }
  0x27 PF: > { %p522_p12 = scmp.ge.s32.totalorder %s712_s22, 1  ;;  %p246_p13 = scmp.lt.s32.totalorder %s712_s22, 5 }
  0x29   : > { %p247_p0 = pnand %p522_p12, %p246_p13 }
  0x2a   : > { %s826_s28 = sand.u32 (!%p247_p0), 1, %s688_s16   ;;  %p286_p1 = scmp.lt.s32.totalorder (!%p247_p0), %s700_s19, 1 }
  0x2b   : > { %250 = sbr.rel (%p247_p0) target bundleno = 337 (0x151), region = 65  ;;  %s907_s1 = sld [smem:[#allocation7_spill]] (!%p247_p0) }
  0x2c   : > { %s545_s5 = smul.u32 (!%p247_p0), 20, %s826_s28  ;;  %p535_p2 = scmp.ne.s32.totalorder (!%p247_p0), %s696_s18, 0 }
  0x2e   : > { %s255_s9 = scalar_lea.vmem (!%p247_p0), [#allocation2], %s545_s5  ;;  %s523_s5 = sshll.u32 (!%p247_p0), %s826_s28, 3 }
  0x30   : > { %s287_s6 = scalar_select %p286_p1, %s700_s19, 1  ;;  %v300_v5 = vld [vmem:[%s255_s9 + $0x10] sm:$0x3]  ;;  %vm320_vm0 = vcmask 1041408   ;;  %v542_v9 = vld [vmem:[%s255_s9 + $0x8] sm:$0xff]  ;;  %v541_v10 = vld [vmem:[%s255_s9] sm:$0xff] }
  0x31   : > { %v310_v6 = vunpack.c.l.b16 %v300_v5  ;;  %v295_v11 = vld [vmem:[%s907_s1] sm:$0xf]  ;;  %vm316_vm1 = vcmask 293888  }
  0x32   : > { %s524_s7 = sshll.u32 %s287_s6, 3  ;;  %s273_s6 = scalar_lea.vmem [#allocation3], %s523_s5 }
  0x33   : > { %s834_s12 = scalar_lea.vmem %s899_s3, %s524_s7  ;;  %s839_s23 = scalar_lea.vmem %s900_s4, %s524_s7  ;;  %v313_v7 = vpack.c.b16 %v310_v6, %v310_v6 }
  0x35   : > { %v322_v8 = vsel %vm320_vm0, %v313_v7, 0 }
  0x36   : > { %329 = vmatpush.bf16.msra.mxu0 %v322_v8 }
  0x3a   : > { %330 = vmatpush.bf16.msra.mxu0 %v542_v9 }
  0x3e   : > { %331 = vmatpush.bf16.msra.mxu0 %v541_v10 }
  0x41   : > { %534 = vmatmul.msk.bf16.vlgmr.msra.gmra.mxu0 %vm316_vm1, %v295_v11 }
  0xbe   : > { %v333_v12 = vpop.f32.mrf.mxu0 }
  0xbf   : > { %337 = vst [vmem:[%s273_s6] sm:$0xff] %v333_v12 }
  0xc2   : > { %341 = sbr.rel (%p535_p2) target bundleno = 202 (0xca), region = 73 }
  0xc6   : > { %v335_v13 = vpop.f32.mrf.mxu0 }
  0xc7   : > { %vm342_vm2 = vcmask 7168   ;;  %v714_v14 = vmov 0.0  }
  0xc8   : > { %343 = vst.msk [vmem:[%s834_s12] sm:$0xff] %vm342_vm2, %v714_v14 }
  0xc9   : > { %344 = vst.msk [vmem:[%s839_s23] sm:$0xff] %vm342_vm2, %v714_v14 }
  0xca PF: > { %346 = vadd.xlane.f32.xlu0 %v333_v12  ;;  %s537_s7 = sshll.u32 %s700_s19, 1  ;;  %s380_s10 = sshll.u32 %s273_s6, 4  ;;  %v352_v15 = vmul.f32 %v333_v12, %v333_v12  ;;  %s381_s10 = int_to_ptr.vmem [resolvable:$true] %s380_s10 }
  0xcb   : > { %s376_s9 = sadd.s32 %s696_s18, %s537_s7  ;;  %s358_s5 = scalar_lea.sflag [#allocation4], %s826_s28 }
  0xcc   : > { %s538_s11 = sshll.u32 %s376_s9, 3  ;;  %s638_s6 = scalar_lea.hbm %s898_s2, 32 }
  0xcd   : > { %s378_s24 = scalar_lea.hbm %s898_s2, %s538_s11 }
  0xce   : > { %s382_s27 = sshll.u32 %s378_s24, 4  ;;  %s383_s27 = int_to_ptr.hbm [resolvable:$true] %s382_s27 }
  0xcf   : > { %s632_s0 = sshra.s32 %s383_s27, 4  ;;  %s633_s0 = int_to_ptr.hbm [resolvable:$true] %s632_s0 }
  0xd0   : > { %s634_s1 = scalar_lea.hbm %s633_s0, 8  ;;  %p639_p6 = scmp.lt.s32.totalorder %s633_s0, %s898_s2 }
  0xd1   : > { %p635_p3 = scmp.ne.s32.totalorder %s633_s0, %s634_s1  ;;  %p640_p7 = scmp.lt.s32.totalorder %s638_s6, %s634_s1 }
  0xd3   : > { %p636_p4 = pnand %p635_p3, %p800_p8  ;;  %p641_p10 = por %p640_p7, %p639_p6 }
  0xd5   : > { %p637_p5 = pneg %p636_p4 }
  0xd7   : > { %p642_p11 = pnand %p641_p10, %p637_p5 }
  0xd9   : > { %645 = shalt.err (!%p642_p11)
}
  0xda   : > { %546 = dma.vmem_to_hbm [thread:$0]  (%p800_p8), %s381_s10, 128, %s383_s27, %s358_s5   ;;  %353 = vadd.xlane.f32.xlu0 %v352_v15  ;;  %v345_v16 = vld [vmem:[%s834_s12] sm:$0xff]  ;;  %vm349_vm3 = vcmask 7168  }
  0xdb   : > { %v351_v19 = vld [vmem:[%s839_s23] sm:$0xff] }
 0x13d   : > { %v347_v17 = vpop.xlane.xlu0 %346 }
 0x13e   : > { %v348_v18 = vadd.f32 %v347_v17, %v345_v16 }
 0x140   : > { %350 = vst.msk [vmem:[%s834_s12] sm:$0xff] %vm349_vm3, %v348_v18 }
 0x14d   : > { %v354_v20 = vpop.xlane.xlu0 %353 }
 0x14e   : > { %v355_v21 = vadd.f32 %v354_v20, %v351_v19 }
 0x150   : > { %356 = vst.msk [vmem:[%s839_s23] sm:$0xff] %vm349_vm3, %v355_v21 }
 0x151 PF: > { %p552_p12 = scmp.ge.s32.totalorder %s712_s22, 2  ;;  %s400_s0 = sand.u32 1, %s684_s15  }
 0x152   : > { %s401_s1 = scalar_lea.sflag [#allocation4], %s400_s0 }
 0x153   : > { %p549_p13 = pnand %p552_p12, %p804_p9 }
 0x155   : > { %p550_p0 = pneg %p549_p13 }
 0x157   : > { %679 = dma.done.wait (%p550_p0), %s401_s1, 128  }
 0x158   : > { %681 = vsyncadd (%p550_p0), %s401_s1, 4294967168  ;;  %s18_s22 = sadd.s32 1, %s712_s22   ;;  %s908_s15 = smov %s688_s16 }
 0x159   : > { %p15_p8 = scmp.ge.s32.totalorder %s18_s22, 6   ;;  %s909_s16 = smov %s692_s17 }
 0x15a   : > { %s910_s17 = smov %s812_s8  ;;  %s911_s18 = smov %s704_s20 }
 0x15b   : > { %s912_s19 = smov %s708_s21  ;;  %s913_s20 = smov %s916_s25 }
 0x15c   : > { %s914_s21 = smov %s920_s26  ;;  %17 = sbr.rel (!%p15_p8) target bundleno = 8 (0x8), region = 137 }
 0x161   :  { %421 = vsyncpa [#allocation4], 1 }
 0x162   :  { %423 = vsyncpa [#allocation4 + $0x1], 1 }

</bundles_post_ra>
